<compile_context>
chip_gen: v7x
topology: tpu7x:2x2x1
jax: 0.10.0
libtpu: 0.0.40
codegen_flags: <defaults>
</compile_context>

<pallas_src>
from collections import defaultdict

import numpy as np
import jax
import jax.numpy as jnp
from jax.experimental import pallas as pl
from jax.experimental.pallas import tpu as pltpu


# ----------------------------------------------------------------------------
# Host-side ontology bookkeeping (mirrors the PyTorch module's __init__ helpers)
# ----------------------------------------------------------------------------
def build_parent_to_child(child_to_parent):
    parent_to_child = defaultdict(list)
    for child_idx, parent_idx in enumerate(child_to_parent):
        if parent_idx != -1:
            parent_to_child[parent_idx].append(child_idx)
    return dict(parent_to_child)


def get_leaf_nodes(child_to_parent):
    return set(range(len(child_to_parent))) - set(
        p for p in child_to_parent if p != -1)


def find_distance_to_root(child_to_parent, node_idx):
    if node_idx < 0:
        return 0
    distance = 1
    p = node_idx
    while child_to_parent[p] != -1:
        distance += 1
        p = child_to_parent[p]
    return distance


def get_node_processing_order(child_to_parent, set_of_leaves):
    items = []
    for node_idx in range(len(child_to_parent)):
        if node_idx not in set_of_leaves:
            items.append(
                {"node_idx": node_idx,
                 "distance": find_distance_to_root(child_to_parent, node_idx)})
    items = sorted(items, reverse=True, key=lambda x: x["distance"])
    return [it["node_idx"] for it in items]


def build_levels_and_perm(child_to_parent):
    """Renumber nodes so each parent's children are contiguous, grouped by level.

    Returns:
      perm:   int array, perm[new_idx] = old_idx (a permutation of all nodes)
      levels: tuple of levels (deepest first); each level is a tuple of
              (parent_new_idx, child_start_new_idx, n_children) with static ints.
              Children of a level-d parent always sit exactly one level deeper,
              so no parent in a level reads another parent of the same level.
    """
    parent_to_child = build_parent_to_child(child_to_parent)
    leaves = get_leaf_nodes(child_to_parent)
    order = get_node_processing_order(child_to_parent, leaves)

    # Group the (already distance-sorted) processing order into levels.
    levels_nodes, cur, cur_d = [], [], None
    for node in order:
        d = find_distance_to_root(child_to_parent, node)
        if cur_d is None or d == cur_d:
            cur.append(node)
            cur_d = d
        else:
            levels_nodes.append(cur)
            cur, cur_d = [node], d
    if cur:
        levels_nodes.append(cur)

    perm, child_range = [], {}
    for level in levels_nodes:          # every non-root node is the child of
        for p in level:                 # exactly one parent -> groups partition
            kids = parent_to_child[p]
            child_range[p] = (len(perm), len(kids))
            perm.extend(int(c) for c in kids)
    placed = set(perm)
    for node in range(len(child_to_parent)):   # roots go at the end
        if node not in placed:
            perm.append(node)

    new_of_old = {old: new for new, old in enumerate(perm)}
    levels = tuple(
        tuple((new_of_old[p], child_range[p][0], child_range[p][1]) for p in level)
        for level in levels_nodes)
    return np.asarray(perm, dtype=np.int64), levels


# ----------------------------------------------------------------------------
# Pallas kernel
# ----------------------------------------------------------------------------
def make_ontology_kernel(levels, mode):
    """levels: tuple of levels of (parent_row, child_start, n) in permuted space."""
    # dot_general dimension numbers:
    #  NT: contract last dims  -> P(N_pad,N) x X(tile_b,N)      -> (N_pad, tile_b)
    #  TN: contract first dims -> S(N_pad,tile_b) x P(N_pad,N)  -> (tile_b, N)
    NT = (((1,), (1,)), ((), ()))
    TN = (((0,), (0,)), ((), ()))

    def core(p_ref, x_ref, o_ref, nodes, sig):
        x = x_ref[...].astype(jnp.float32)                  # (tile_b, N)
        pmat = p_ref[...]                                   # (N_pad, N) one-hot
        # Fused transpose + node permutation on the otherwise-idle MXU:
        #   nodes[new, b] = x[b, perm[new]]   (exact: one-hot rows, HIGHEST prec)
        nodes[...] = jax.lax.dot_general(
            pmat, x, NT,
            precision=jax.lax.Precision.HIGHEST,
            preferred_element_type=jnp.float32)

        for level in levels:                                # deepest level first
            aggs = []
            for parent_row, start, n in level:              # all reads of a level...
                vals = nodes[start:start + n, :]            # contiguous sublane slice
                if mode == "godel":
                    agg = jnp.max(vals, axis=0)             # sublane reduce (XLU)
                else:
                    if mode == "weighted_lukasiewicz":
                        vals = vals * sig[start:start + n, :]   # (n,1) lane bcast
                    agg = jnp.clip(jnp.sum(vals, axis=0), 0.0, 1.0)
                aggs.append((parent_row, agg))
            for parent_row, agg in aggs:                    # ...then all writes (ILP;
                nodes[parent_row, :] = agg                  # a level never reads its
                                                            # own parent rows)
        # Inverse permutation + transpose back, again via the one-hot matrix:
        #   out[b, old] = nodes[new_of(old), b]
        out = jax.lax.dot_general(
            nodes[...], pmat, TN,
            precision=jax.lax.Precision.HIGHEST,
            preferred_element_type=jnp.float32)
        o_ref[...] = out.astype(o_ref.dtype)

    if mode == "weighted_lukasiewicz":
        def kernel(p_ref, sig_ref, x_ref, o_ref, nodes):
            core(p_ref, x_ref, o_ref, nodes, sig_ref[...])
    elif mode in ("godel", "lukasiewicz"):
        def kernel(p_ref, x_ref, o_ref, nodes):
            core(p_ref, x_ref, o_ref, nodes, None)
    else:
        raise ValueError("Unsupported value of prob_aggregation")
    return kernel


def _choose_tile_b(B, N, N_pad):
    """Lane-aligned batch tile chosen by a VMEM byte budget, not a lane cap."""
    LANE = 128
    b128 = ((B + LANE - 1) // LANE) * LANE
    # Per batch column (f32): 4 double-buffered data blocks (in + out) of width N
    # plus one node-major scratch column of width N_pad.
    per_col = 4 * (4 * N + N_pad)
    data_budget = 24 * 1024 * 1024          # ~half of the 48 MiB VMEM limit below
    tile_b = (data_budget // per_col) // LANE * LANE
    tile_b = min(tile_b, 64 * 1024)         # bound per-step latency
    if b128 >= 2 * LANE:                    # keep >= 2 grid steps (v7x megacore)
        tile_b = min(tile_b, max(LANE, (b128 // 2) // LANE * LANE))
    tile_b = max(LANE, min(tile_b, b128))
    return tile_b


def ontology_forward(x, w, child_to_parent, mode, *, tile_b=None):
    """x: [batch, num_nodes] float; w: [num_nodes] float (weights param)."""
    B, N = x.shape
    assert N == len(child_to_parent)
    perm, levels = build_levels_and_perm(child_to_parent)
    N_pad = max(8, ((N + 7) // 8) * 8)      # VMEM-only padding (never hits HBM)

    # One-hot "transpose + permute" matrix. Padded rows are all-zero, so the
    # padded scratch rows are written as zeros and contribute nothing on the
    # way back out.
    p_np = np.zeros((N_pad, N), np.float32)
    p_np[np.arange(N), perm] = 1.0
    pmat = jnp.asarray(p_np)

    if tile_b is None:
        tile_b = _choose_tile_b(B, N, N_pad)
    # Pad the batch (lane) dim so every output block is lane-aligned/dense and
    # there are no partial grid blocks.
    B_pad = ((B + tile_b - 1) // tile_b) * tile_b
    x_in = x if B_pad == B else jnp.pad(x, ((0, B_pad - B), (0, 0)))

    grid = (B_pad // tile_b,)
    x_spec = pl.BlockSpec((tile_b, N), lambda b: (b, 0))
    p_spec = pl.BlockSpec((N_pad, N), lambda b: (0, 0))

    in_specs = [p_spec]
    args = [pmat]
    if mode == "weighted_lukasiewicz":
        # sigmoid(weights) computed ONCE on the host (tiny (N,) op), permuted
        # into the kernel's node order, padded into an (N_pad, 1) block.
        sig = jax.nn.sigmoid(jnp.asarray(w, jnp.float32))[jnp.asarray(perm)]
        sig = jnp.pad(sig, (0, N_pad - N)).reshape(N_pad, 1)
        in_specs.append(pl.BlockSpec((N_pad, 1), lambda b: (0, 0)))
        args.append(sig)
    in_specs.append(x_spec)
    args.append(x_in)

    kernel = make_ontology_kernel(levels, mode)
    out = pl.pallas_call(
        kernel,
        out_shape=jax.ShapeDtypeStruct((B_pad, N), x.dtype),
        grid=grid,
        in_specs=in_specs,
        out_specs=x_spec,
        scratch_shapes=[pltpu.VMEM((N_pad, tile_b), jnp.float32)],
        compiler_params=pltpu.CompilerParams(
            # "parallel" lets the batch grid shard across TensorCores on v7x;
            # it is a no-op on single-TC v5e/v6e.
            dimension_semantics=("parallel",),
            # Above the v5e (16 MiB) / v6e (32 MiB) defaults, within v7x's
            # 64 MiB physical VMEM; data blocks are budgeted to ~half of this.
            vmem_limit_bytes=48 * 1024 * 1024,
        ),
    )(*args)
    return out if B_pad == B else out[:B]


# ----------------------------------------------------------------------------
# Pure-numpy reference (mirrors PyTorch forward semantics exactly)
# ----------------------------------------------------------------------------
def reference_forward(x, w, child_to_parent, mode):
    xt = np.array(x, dtype=np.float32).T.copy()  # [num_nodes, batch]
    wn = np.array(w, dtype=np.float32)
    parent_to_child = build_parent_to_child(child_to_parent)
    leaves = get_leaf_nodes(child_to_parent)
    order = get_node_processing_order(child_to_parent, leaves)
    for node in order:
        children = np.array(parent_to_child[node])
        vals = xt[children]
        if mode == "godel":
            rep = vals.max(axis=0)
        elif mode == "lukasiewicz":
            rep = np.clip(vals.sum(axis=0), 0.0, 1.0)
        elif mode == "weighted_lukasiewicz":
            sw = 1.0 / (1.0 + np.exp(-wn[children]))
            rep = np.clip((vals * sw[:, None]).sum(axis=0), 0.0, 1.0)
        else:
            raise ValueError(mode)
        xt[node] = rep
    return xt.T


if __name__ == "__main__":
    # Synthetic ontology (replaces reading config['ontology_file']):
    # child_to_parent[i] = parent of node i, -1 means root. num_types = 16.
    child_to_parent = [-1, 0, 0, 1, 1, 1, 2, 2, 3, 3, 4, 4, 6, 6, 7, 7]
    num_types = len(child_to_parent)
    batch = 256          # lane-dense; auto tile_b=128 -> 2 pipelined grid steps

    key = jax.random.PRNGKey(0)
    k_x, k_w = jax.random.split(key)
    # predicted_probabilities: batch_size x num_nodes_in_ontology, values in [0,1]
    x = jax.nn.sigmoid(jax.random.normal(k_x, (batch, num_types), dtype=jnp.float32))
    # weights_lukasiewicz parameter (deterministic init, shape = num_types)
    w = jax.random.normal(k_w, (num_types,), dtype=jnp.float32)

    ok = True
    for mode in ("godel", "lukasiewicz", "weighted_lukasiewicz"):
        out = jax.block_until_ready(ontology_forward(x, w, child_to_parent, mode))
        ref = reference_forward(np.asarray(x), np.asarray(w), child_to_parent, mode)
        if out.shape != ref.shape or not np.allclose(
                np.asarray(out), ref, atol=1e-5, rtol=1e-5):
            ok = False
            print(f"MISMATCH in mode {mode}")

    # Also exercise the batch-padding path (B not a multiple of 128).
    x_odd = x[:200]
    out = jax.block_until_ready(
        ontology_forward(x_odd, w, child_to_parent, "weighted_lukasiewicz"))
    ref = reference_forward(np.asarray(x_odd), np.asarray(w), child_to_parent,
                            "weighted_lukasiewicz")
    if out.shape != ref.shape or not np.allclose(
            np.asarray(out), ref, atol=1e-5, rtol=1e-5):
        ok = False
        print("MISMATCH in padded-batch case")

    if ok:
        print("KERNEL_OK")
</pallas_src>

<mosaic_0001>
module attributes {stable_mosaic.version = 11 : i64} {
  func.func @kernel(%arg0: i32, %arg1: memref<16x16xf32, #tpu.memory_space<vmem>>, %arg2: memref<128x16xf32, #tpu.memory_space<vmem>>, %arg3: memref<128x16xf32, #tpu.memory_space<vmem>>, %arg4: memref<16x128xf32, #tpu.memory_space<vmem>>) attributes {dimension_semantics = [#tpu.dimension_semantics<parallel>], iteration_bounds = array<i64: 2>, scalar_prefetch = 0 : i64, scratch_operands = 1 : i64, tpu.core_type = #tpu.core_type<tc>, window_params = [{pipeline_mode = #tpu.pipeline_mode<synchronous>, transform_indices = @transform_0, window_bounds = array<i64: 16, 16>}, {transform_indices = @transform_1, window_bounds = array<i64: 128, 16>}, {transform_indices = @transform_2, window_bounds = array<i64: 128, 16>}]} {
    %c0 = arith.constant 0 : index
    %c0_0 = arith.constant 0 : index
    %0 = vector.load %arg2[%c0, %c0_0] : memref<128x16xf32, #tpu.memory_space<vmem>>, vector<128x16xf32>
    %c0_1 = arith.constant 0 : index
    %c0_2 = arith.constant 0 : index
    %1 = vector.load %arg1[%c0_1, %c0_2] : memref<16x16xf32, #tpu.memory_space<vmem>>, vector<16x16xf32>
    %cst = arith.constant dense<0.000000e+00> : vector<16x128xf32>
    %2 = tpu.matmul %1, %0, %cst {dimension_numbers = #tpu.dot_dimension_numbers<[1], [1], [0], [0], [0, 0, 1, 0], [], []>, precision = #tpu.contract_precision<fp32>} : vector<16x16xf32>, vector<128x16xf32>, vector<16x128xf32> -> vector<16x128xf32>
    %c0_3 = arith.constant 0 : index
    %c0_4 = arith.constant 0 : index
    %3 = vector.load %arg4[%c0_3, %c0_4] : memref<16x128xf32, #tpu.memory_space<vmem>>, vector<16x128xf32>
    tpu.vector_store %arg4[%c0_3, %c0_4], %2 {strides = array<i32>} : memref<16x128xf32, #tpu.memory_space<vmem>>, vector<16x128xf32>,
    %c0_5 = arith.constant 0 : index
    %c0_6 = arith.constant 0 : index
    %4 = vector.load %arg4[%c0_5, %c0_6] : memref<16x128xf32, #tpu.memory_space<vmem>>, vector<2x128xf32>
    %cst_7 = arith.constant dense<0xFF800000> : vector<128xf32>
    %5 = vector.multi_reduction <maximumf>, %4, %cst_7 [0] : vector<2x128xf32> to vector<128xf32>
    %c2 = arith.constant 2 : index
    %c0_8 = arith.constant 0 : index
    %6 = vector.load %arg4[%c2, %c0_8] : memref<16x128xf32, #tpu.memory_space<vmem>>, vector<2x128xf32>
    %cst_9 = arith.constant dense<0xFF800000> : vector<128xf32>
    %7 = vector.multi_reduction <maximumf>, %6, %cst_9 [0] : vector<2x128xf32> to vector<128xf32>
    %c4 = arith.constant 4 : index
    %c0_10 = arith.constant 0 : index
    %8 = vector.load %arg4[%c4, %c0_10] : memref<16x128xf32, #tpu.memory_space<vmem>>, vector<2x128xf32>
    %cst_11 = arith.constant dense<0xFF800000> : vector<128xf32>
    %9 = vector.multi_reduction <maximumf>, %8, %cst_11 [0] : vector<2x128xf32> to vector<128xf32>
    %c6 = arith.constant 6 : index
    %c0_12 = arith.constant 0 : index
    %10 = vector.load %arg4[%c6, %c0_12] : memref<16x128xf32, #tpu.memory_space<vmem>>, vector<2x128xf32>
    %cst_13 = arith.constant dense<0xFF800000> : vector<128xf32>
    %11 = vector.multi_reduction <maximumf>, %10, %cst_13 [0] : vector<2x128xf32> to vector<128xf32>
    %c8 = arith.constant 8 : index
    %c0_14 = arith.constant 0 : index
    %12 = vector.load %arg4[%c8, %c0_14] : memref<16x128xf32, #tpu.memory_space<vmem>>, vector<1x128xf32>
    %13 = vector.shape_cast %12 : vector<1x128xf32> to vector<128xf32>
    %14 = vector.shape_cast %5 : vector<128xf32> to vector<1x128xf32>
    tpu.vector_store %arg4[%c8, %c0_14], %14 {strides = array<i32>} : memref<16x128xf32, #tpu.memory_space<vmem>>, vector<1x128xf32>,
    %c9 = arith.constant 9 : index
    %c0_15 = arith.constant 0 : index
    %15 = vector.load %arg4[%c9, %c0_15] : memref<16x128xf32, #tpu.memory_space<vmem>>, vector<1x128xf32>
    %16 = vector.shape_cast %15 : vector<1x128xf32> to vector<128xf32>
    %17 = vector.shape_cast %7 : vector<128xf32> to vector<1x128xf32>
    tpu.vector_store %arg4[%c9, %c0_15], %17 {strides = array<i32>} : memref<16x128xf32, #tpu.memory_space<vmem>>, vector<1x128xf32>,
    %c11 = arith.constant 11 : index
    %c0_16 = arith.constant 0 : index
    %18 = vector.load %arg4[%c11, %c0_16] : memref<16x128xf32, #tpu.memory_space<vmem>>, vector<1x128xf32>
    %19 = vector.shape_cast %18 : vector<1x128xf32> to vector<128xf32>
    %20 = vector.shape_cast %9 : vector<128xf32> to vector<1x128xf32>
    tpu.vector_store %arg4[%c11, %c0_16], %20 {strides = array<i32>} : memref<16x128xf32, #tpu.memory_space<vmem>>, vector<1x128xf32>,
    %c12 = arith.constant 12 : index
    %c0_17 = arith.constant 0 : index
    %21 = vector.load %arg4[%c12, %c0_17] : memref<16x128xf32, #tpu.memory_space<vmem>>, vector<1x128xf32>
    %22 = vector.shape_cast %21 : vector<1x128xf32> to vector<128xf32>
    %23 = vector.shape_cast %11 : vector<128xf32> to vector<1x128xf32>
    tpu.vector_store %arg4[%c12, %c0_17], %23 {strides = array<i32>} : memref<16x128xf32, #tpu.memory_space<vmem>>, vector<1x128xf32>,
    %c8_18 = arith.constant 8 : index
    %c0_19 = arith.constant 0 : index
    %24 = vector.load %arg4[%c8_18, %c0_19] : memref<16x128xf32, #tpu.memory_space<vmem>>, vector<3x128xf32>
    %cst_20 = arith.constant dense<0xFF800000> : vector<128xf32>
    %25 = vector.multi_reduction <maximumf>, %24, %cst_20 [0] : vector<3x128xf32> to vector<128xf32>
    %c11_21 = arith.constant 11 : index
    %c0_22 = arith.constant 0 : index
    %26 = vector.load %arg4[%c11_21, %c0_22] : memref<16x128xf32, #tpu.memory_space<vmem>>, vector<2x128xf32>
    %cst_23 = arith.constant dense<0xFF800000> : vector<128xf32>
    %27 = vector.multi_reduction <maximumf>, %26, %cst_23 [0] : vector<2x128xf32> to vector<128xf32>
    %c13 = arith.constant 13 : index
    %c0_24 = arith.constant 0 : index
    %28 = vector.load %arg4[%c13, %c0_24] : memref<16x128xf32, #tpu.memory_space<vmem>>, vector<1x128xf32>
    %29 = vector.shape_cast %28 : vector<1x128xf32> to vector<128xf32>
    %30 = vector.shape_cast %25 : vector<128xf32> to vector<1x128xf32>
    tpu.vector_store %arg4[%c13, %c0_24], %30 {strides = array<i32>} : memref<16x128xf32, #tpu.memory_space<vmem>>, vector<1x128xf32>,
    %c14 = arith.constant 14 : index
    %c0_25 = arith.constant 0 : index
    %31 = vector.load %arg4[%c14, %c0_25] : memref<16x128xf32, #tpu.memory_space<vmem>>, vector<1x128xf32>
    %32 = vector.shape_cast %31 : vector<1x128xf32> to vector<128xf32>
    %33 = vector.shape_cast %27 : vector<128xf32> to vector<1x128xf32>
    tpu.vector_store %arg4[%c14, %c0_25], %33 {strides = array<i32>} : memref<16x128xf32, #tpu.memory_space<vmem>>, vector<1x128xf32>,
    %c13_26 = arith.constant 13 : index
    %c0_27 = arith.constant 0 : index
    %34 = vector.load %arg4[%c13_26, %c0_27] : memref<16x128xf32, #tpu.memory_space<vmem>>, vector<2x128xf32>
    %cst_28 = arith.constant dense<0xFF800000> : vector<128xf32>
    %35 = vector.multi_reduction <maximumf>, %34, %cst_28 [0] : vector<2x128xf32> to vector<128xf32>
    %c15 = arith.constant 15 : index
    %c0_29 = arith.constant 0 : index
    %36 = vector.load %arg4[%c15, %c0_29] : memref<16x128xf32, #tpu.memory_space<vmem>>, vector<1x128xf32>
    %37 = vector.shape_cast %36 : vector<1x128xf32> to vector<128xf32>
    %38 = vector.shape_cast %35 : vector<128xf32> to vector<1x128xf32>
    tpu.vector_store %arg4[%c15, %c0_29], %38 {strides = array<i32>} : memref<16x128xf32, #tpu.memory_space<vmem>>, vector<1x128xf32>,
    %c0_30 = arith.constant 0 : index
    %c0_31 = arith.constant 0 : index
    %39 = vector.load %arg4[%c0_30, %c0_31] : memref<16x128xf32, #tpu.memory_space<vmem>>, vector<16x128xf32>
    %cst_32 = arith.constant dense<0.000000e+00> : vector<128x16xf32>
    %40 = tpu.matmul %39, %1, %cst_32 {dimension_numbers = #tpu.dot_dimension_numbers<[0], [0], [1], [1], [0, 1, 1, 1], [], []>, precision = #tpu.contract_precision<fp32>} : vector<16x128xf32>, vector<16x16xf32>, vector<128x16xf32> -> vector<128x16xf32>
    %c0_33 = arith.constant 0 : index
    %c0_34 = arith.constant 0 : index
    %41 = vector.load %arg3[%c0_33, %c0_34] : memref<128x16xf32, #tpu.memory_space<vmem>>, vector<128x16xf32>
    tpu.vector_store %arg3[%c0_33, %c0_34], %40 {strides = array<i32>} : memref<128x16xf32, #tpu.memory_space<vmem>>, vector<128x16xf32>,
    return
  }
  func.func @transform_0(%arg0: i32) -> (i32, i32) {
    %c0_i32 = arith.constant 0 : i32
    %c0_i32_0 = arith.constant 0 : i32
    %c0_i32_1 = arith.constant 0 : i32
    return %c0_i32, %c0_i32_0 : i32, i32
  }
  func.func @transform_1(%arg0: i32) -> (i32, i32) {
    %c0_i32 = arith.constant 0 : i32
    %c0_i32_0 = arith.constant 0 : i32
    return %arg0, %c0_i32 : i32, i32
  }
  func.func @transform_2(%arg0: i32) -> (i32, i32) {
    %c0_i32 = arith.constant 0 : i32
    %c0_i32_0 = arith.constant 0 : i32
    return %arg0, %c0_i32 : i32, i32
  }
}

</mosaic_0001>

<bundles_post_ra>
// kernel: tpu_custom_call.1
= control target key start
LH: loop header
LB: loop body
LE: loop exit
PB: predicated region body
PF: predicated region fallthrough
CT: control target
= control target key end

     0   :  { %s3172_s9 = smov 0   ;;  %s3858_s0 = inlined_call_operand.vmem [shape: f32[16,16], index: 0, kind: input, shape index: {}]   ;;  %s3859_s1 = inlined_call_operand.vmem [shape: f32[256,16], index: 1, kind: input, shape index: {}]   ;;  %s3860_s2 = inlined_call_operand.vmem [shape: f32[256,16], index: 2, kind: output, shape index: {}]  }
   0x1 LB: > { %s2229_s10 = sadd.s32 4294967295, %s3155_s9   ;;  %p2233_p0 = scmp.ge.s32.totalorder %s3155_s9, 1  ;;  %s3155_s9 = sphi %s3172_s9, %s12_s9  }
   0x2   : > { %p113_p1 = scmp.lt.s32.totalorder %s3155_s9, 3 }
   0x4   : > { %p114_p2 = pnand %p2233_p0, %p113_p1 }
   0x5   : > { %s2234_s11 = sshll.u32 (!%p114_p2), %s2229_s10, 4  ;;  %vm165_vm0 = vcmask (!%p114_p2), 130048   ;;  %v3183_v0 = vld [vmem:[%s3858_s0] sm:$0xff] (!%p114_p2)  ;;  %vm907_vm1 = vcmask (!%p114_p2), 1041408   ;;  %vm944_vm2 = vcmask (!%p114_p2), 1042432  }
   0x6   : > { %117 = sbr.rel (%p114_p2) target bundleno = 1207 (0x4b7), region = 28  ;;  %p136_p3 = scmp.lt.s32.totalorder (!%p114_p2), %s2234_s11, 31  ;;  %v3187_v1 = vsel (!%p114_p2), %vm165_vm0, %v3183_v0, 0 }
   0x7   : > { %v3190_v2 = vand.u32 (!%p114_p2), 4294901760, %v3187_v1 }
   0x9   : > { %2523 = vmatprep.mubr.f32.mxu0 (!%p114_p2), %v3190_v2 }
   0xd   : > { %s3862_s11 = smov (!%p136_p3, %s2234_s11), 31 }
   0xe   : > { %s2235_s14 = sshll.u32 %s3862_s11, 3 }
   0xf   : > { %s3201_s17 = scalar_lea.vmem %s3859_s1, %s2235_s14  ;;  %s3821_s22 = scalar_lea.vmem %s3860_s2, %s2235_s14 }
  0x10   : > { %v147_v3 = vld [vmem:[%s3201_s17] sm:$0xff]  ;;  %v148_v4 = vld [vmem:[%s3201_s17 + $0x8] sm:$0xff]  ;;  %v149_v5 = vld [vmem:[%s3201_s17 + $0x10] sm:$0xff] }
  0x11   : > { %v173_v6 = vsel %vm165_vm0, %v147_v3, 0  ;;  %v176_v7 = vsel %vm165_vm0, %v148_v4, 0  ;;  %v150_v8 = vld [vmem:[%s3201_s17 + $0x18] sm:$0xff]  ;;  %v179_v9 = vsel %vm165_vm0, %v149_v5, 0  ;;  %v151_v10 = vld [vmem:[%s3201_s17 + $0x20] sm:$0xff]  ;;  %v152_v11 = vld [vmem:[%s3201_s17 + $0x28] sm:$0xff] }
  0x12   : > { %v221_v12 = vand.u32 4294901760, %v173_v6  ;;  %v224_v13 = vand.u32 4294901760, %v176_v7  ;;  %v182_v14 = vsel %vm165_vm0, %v150_v8, 0  ;;  %v227_v15 = vand.u32 4294901760, %v179_v9  ;;  %v153_v16 = vld [vmem:[%s3201_s17 + $0x30] sm:$0xff]  ;;  %v154_v20 = vld [vmem:[%s3201_s17 + $0x38] sm:$0xff] }
  0x13   : > { %v230_v17 = vand.u32 4294901760, %v182_v14  ;;  %v185_v18 = vsel %vm165_vm0, %v151_v10, 0  ;;  %v188_v19 = vsel %vm165_vm0, %v152_v11, 0  ;;  %v3218_v21 = vsel %vm165_vm0, %v153_v16, 0  ;;  %v155_v45 = vld [vmem:[%s3201_s17 + $0x40] sm:$0xff]  ;;  %v156_v50 = vld [vmem:[%s3201_s17 + $0x48] sm:$0xff] }
  0x14   : > { %v3220_v22 = vpack.c.bf16 %v224_v13, %v221_v12  ;;  %v3222_v23 = vsub.f32 %v173_v6, %v221_v12  ;;  %v3224_v24 = vsub.f32 %v176_v7, %v224_v13  ;;  %v3226_v25 = vsub.f32 %v179_v9, %v227_v15  ;;  %v157_v63 = vld [vmem:[%s3201_s17 + $0x50] sm:$0xff]  ;;  %v158_v3 = vld [vmem:[%s3201_s17 + $0x58] sm:$0xff]  ;;  %v159_v7 = vld [vmem:[%s3201_s17 + $0x60] sm:$0xff] }
  0x15   : > { %v3228_v26 = vpack.c.bf16 %v230_v17, %v227_v15  ;;  %v3230_v27 = vsub.f32 %v182_v14, %v230_v17  ;;  %v233_v28 = vand.u32 4294901760, %v185_v18  ;;  %v236_v29 = vand.u32 4294901760, %v188_v19  ;;  %v160_v8 = vld [vmem:[%s3201_s17 + $0x68] sm:$0xff]  ;;  %v161_v16 = vld [vmem:[%s3201_s17 + $0x70] sm:$0xff]  ;;  %v162_v17 = vld [vmem:[%s3201_s17 + $0x78] sm:$0xff] }
  0x16   : > { %v324_v30 = vand.u32 4294901760, %v3222_v23  ;;  %v331_v31 = vand.u32 4294901760, %v3224_v24  ;;  %v338_v32 = vand.u32 4294901760, %v3226_v25  ;;  %v194_v33 = vsel %vm165_vm0, %v154_v20, 0  ;;  %2835 = vmatprep.subr.bf16.mxu1 %v3220_v22 }
  0x17   : > { %v345_v34 = vand.u32 4294901760, %v3230_v27  ;;  %v3238_v35 = vsub.f32 %v185_v18, %v233_v28  ;;  %v3240_v36 = vsub.f32 %v188_v19, %v236_v29  ;;  %2837 = vmatpush3.bf16.xpose.msra.mxu1 %v3220_v22  ;;  %v239_v40 = vand.u32 4294901760, %v3218_v21 }
  0x18   : > { %v325_v37 = vsub.f32 %v3222_v23, %v324_v30  ;;  %v332_v38 = vsub.f32 %v3224_v24, %v331_v31  ;;  %v339_v39 = vsub.f32 %v3226_v25, %v338_v32  ;;  %2839 = vmatprep.subr.bf16.mxu1 %v3228_v26  ;;  %v242_v44 = vand.u32 4294901760, %v194_v33 }
  0x19   : > { %v346_v41 = vsub.f32 %v3230_v27, %v345_v34  ;;  %v352_v42 = vand.u32 4294901760, %v3238_v35  ;;  %v359_v43 = vand.u32 4294901760, %v3240_v36  ;;  %v3261_v49 = vsub.f32 %v3218_v21, %v239_v40 }
  0x1a   : > { %v326_v46 = vand.u32 4294901760, %v325_v37  ;;  %v333_v47 = vand.u32 4294901760, %v332_v38  ;;  %v340_v48 = vand.u32 4294901760, %v339_v39  ;;  %v3270_v55 = vsub.f32 %v194_v33, %v242_v44 }
  0x1b   : > { %v347_v51 = vand.u32 4294901760, %v346_v41  ;;  %v353_v52 = vsub.f32 %v3238_v35, %v352_v42  ;;  %v360_v54 = vsub.f32 %v3240_v36, %v359_v43  ;;  %v3273_v56 = vsel %vm165_vm0, %v155_v45, 0 }
  0x1c   : > { %v2866_v53 = vpack.c.bf16 %v333_v47, %v326_v46  ;;  %v366_v58 = vand.u32 4294901760, %v3261_v49  ;;  %v200_v59 = vsel %vm165_vm0, %v156_v50, 0  ;;  %v3277_v60 = vpack.c.bf16 %v236_v29, %v233_v28 }
  0x1d   : > { %v2870_v57 = vpack.c.bf16 %v347_v51, %v340_v48  ;;  %v373_v61 = vand.u32 4294901760, %v3270_v55  ;;  %v245_v62 = vand.u32 4294901760, %v3273_v56  ;;  %v354_v4 = vand.u32 4294901760, %v353_v52 }
  0x1e   : > { %2867 = vmatprep.subr.bf16.mxu0 %v2866_v53  ;;  %v361_v5 = vand.u32 4294901760, %v360_v54  ;;  %v248_v6 = vand.u32 4294901760, %v200_v59  ;;  %v367_v9 = vsub.f32 %v3261_v49, %v366_v58  ;;  %v203_v11 = vsel %vm165_vm0, %v157_v63, 0 }
  0x1f   : > { %2869 = vmatpush3.bf16.xpose.msra.mxu0 %v2866_v53  ;;  %2841 = vmatpush3.bf16.xpose.msra.mxu1 %v3228_v26  ;;  %v374_v10 = vsub.f32 %v3270_v55, %v373_v61  ;;  %v206_v12 = vsel %vm165_vm0, %v158_v3, 0  ;;  %v3296_v13 = vsub.f32 %v3273_v56, %v245_v62  ;;  %v3299_v14 = vsel %vm165_vm0, %v159_v7, 0 }
  0x20   : > { %2871 = vmatprep.subr.bf16.mxu0 %v2870_v57  ;;  %2843 = vmatprep.subr.bf16.mxu1 %v3277_v60  ;;  %v3302_v15 = vsel %vm165_vm0, %v160_v8, 0  ;;  %v2874_v18 = vpack.c.bf16 %v361_v5, %v354_v4  ;;  %v3306_v19 = vpack.c.bf16 %v242_v44, %v239_v40  ;;  %v3308_v20 = vsub.f32 %v200_v59, %v248_v6 }
  0x21   : > { %v368_v21 = vand.u32 4294901760, %v367_v9  ;;  %v375_v28 = vand.u32 4294901760, %v374_v10  ;;  %v251_v29 = vand.u32 4294901760, %v203_v11  ;;  %v254_v33 = vand.u32 4294901760, %v206_v12 }
  0x22   : > { %v257_v37 = vand.u32 4294901760, %v3299_v14  ;;  %v260_v38 = vand.u32 4294901760, %v3302_v15  ;;  %v3313_v39 = vsel %vm165_vm0, %v161_v16, 0  ;;  %v3316_v41 = vsel %vm165_vm0, %v162_v17, 0 }
  0x23   : > { %v380_v40 = vand.u32 4294901760, %v3296_v13  ;;  %v387_v44 = vand.u32 4294901760, %v3308_v20  ;;  %v263_v45 = vand.u32 4294901760, %v3313_v39  ;;  %v266_v46 = vand.u32 4294901760, %v3316_v41 }
  0x24   : > { %v3325_v47 = vpack.c.bf16 %v3224_v24, %v3222_v23  ;;  %v3328_v48 = vsub.f32 %v203_v11, %v251_v29  ;;  %v2878_v50 = vpack.c.bf16 %v375_v28, %v368_v21  ;;  %v3330_v51 = vsub.f32 %v206_v12, %v254_v33 }
  0x25   : > { %v3333_v52 = vsub.f32 %v3299_v14, %v257_v37  ;;  %v3336_v53 = vsub.f32 %v3302_v15, %v260_v38  ;;  %v3339_v54 = vsub.f32 %v3313_v39, %v263_v45  ;;  %v3342_v56 = vsub.f32 %v3316_v41, %v266_v46 }
  0x26   : > { %v3350_v59 = vpack.c.bf16 %v3240_v36, %v3238_v35  ;;  %v381_v63 = vsub.f32 %v3296_v13, %v380_v40  ;;  %v388_v3 = vsub.f32 %v3308_v20, %v387_v44  ;;  %v3360_v4 = vpack.c.bf16 %v3270_v55, %v3261_v49 }
  0x27   : > { %2873 = vmatpush3.bf16.xpose.msra.mxu0 %v2870_v57  ;;  %2845 = vmatpush3.bf16.xpose.msra.mxu1 %v3277_v60  ;;  %v3346_v57 = vpack.c.bf16 %v3230_v27, %v3226_v25  ;;  %v3364_v5 = vpack.c.bf16 %v3308_v20, %v3296_v13  ;;  %v3368_v7 = vpack.c.bf16 %v3330_v51, %v3328_v48  ;;  %v394_v14 = vand.u32 4294901760, %v3328_v48 }
  0x28   : > { %2875 = vmatprep.subr.bf16.mxu0 %v2874_v18  ;;  %2847 = vmatprep.subr.bf16.mxu1 %v3306_v19  ;;  %v3372_v8 = vpack.c.bf16 %v3336_v53, %v3333_v52  ;;  %v3376_v9 = vpack.c.bf16 %v3342_v56, %v3339_v54  ;;  %v3378_v10 = vpack.c.bf16 %v248_v6, %v245_v62  ;;  %v382_v11 = vand.u32 4294901760, %v381_v63 }
  0x29   : > { %v389_v12 = vand.u32 4294901760, %v388_v3  ;;  %v401_v15 = vand.u32 4294901760, %v3330_v51  ;;  %v395_v17 = vsub.f32 %v3328_v48, %v394_v14  ;;  %v3390_v6 = vpack.c.bf16 %v254_v33, %v251_v29 }
  0x2a   : > { %v408_v28 = vand.u32 4294901760, %v3333_v52  ;;  %v415_v39 = vand.u32 4294901760, %v3336_v53  ;;  %v3402_v33 = vpack.c.bf16 %v260_v38, %v257_v37  ;;  %v3414_v38 = vpack.c.bf16 %v266_v46, %v263_v45 }
  0x2b   : > { %v2882_v16 = vpack.c.bf16 %v389_v12, %v382_v11  ;;  %v402_v62 = vsub.f32 %v3330_v51, %v401_v15  ;;  %v422_v11 = vand.u32 4294901760, %v3339_v54  ;;  %v429_v12 = vand.u32 4294901760, %v3342_v56 }
  0x2c   : > { %v409_v63 = vsub.f32 %v3333_v52, %v408_v28  ;;  %v416_v29 = vsub.f32 %v3336_v53, %v415_v39  ;;  %v2974_v25 = vpack.c.bf16 %v373_v61, %v366_v58  ;;  %v2978_v27 = vpack.c.bf16 %v387_v44, %v380_v40 }
  0x2d   : > { %v403_v21 = vand.u32 4294901760, %v402_v62  ;;  %v423_v62 = vsub.f32 %v3339_v54, %v422_v11  ;;  %v430_v37 = vsub.f32 %v3342_v56, %v429_v12  ;;  %v2990_v35 = vpack.c.bf16 %v429_v12, %v422_v11 }
  0x2e   : > { %v417_v3 = vand.u32 4294901760, %v416_v29 }
  0x2f   : > { %2877 = vmatpush3.bf16.xpose.msra.mxu0 %v2874_v18  ;;  %2849 = vmatpush3.bf16.xpose.msra.mxu1 %v3306_v19  ;;  %v396_v18 = vand.u32 4294901760, %v395_v17 }
  0x30   : > { %2879 = vmatprep.subr.bf16.mxu0 %v2878_v50  ;;  %2851 = vmatprep.subr.bf16.mxu1 %v3378_v10 }
  0x31   : > { %v2886_v41 = vpack.c.bf16 %v403_v21, %v396_v18  ;;  %v424_v18 = vand.u32 4294901760, %v423_v62  ;;  %v431_v21 = vand.u32 4294901760, %v430_v37 }
  0x37   : > { %2881 = vmatpush3.bf16.xpose.msra.mxu0 %v2878_v50  ;;  %2853 = vmatpush3.bf16.xpose.msra.mxu1 %v3378_v10  ;;  %v410_v50 = vand.u32 4294901760, %v409_v63  ;;  %v1054_v63 = vand.u32 4294901760, %v3183_v0 }
  0x38   : > { %2883 = vmatprep.subr.bf16.mxu0 %v2882_v16  ;;  %2855 = vmatprep.subr.bf16.mxu1 %v3390_v6 }
  0x39   : > { %v2890_v17 = vpack.c.bf16 %v417_v3, %v410_v50  ;;  %v2894_v50 = vpack.c.bf16 %v431_v21, %v424_v18 }
  0x3f   : > { %2885 = vmatpush3.bf16.xpose.msra.mxu0 %v2882_v16  ;;  %2857 = vmatpush3.bf16.xpose.msra.mxu1 %v3390_v6  ;;  %v3419_v16 = vld [vmem:[%s3858_s0 + $0x8] sm:$0xff] }
  0x40   : > { %2887 = vmatprep.subr.bf16.mxu0 %v2886_v41  ;;  %2859 = vmatprep.subr.bf16.mxu1 %v3402_v33  ;;  %v1057_v29 = vand.u32 4294901760, %v3419_v16  ;;  %v170_v46 = vsel %vm165_vm0, %v3419_v16, 0 }
  0x41   : > { %v3440_v3 = vand.u32 4294901760, %v170_v46 }
  0x42   : > { %v3429_v45 = vpack.c.bf16 %v1057_v29, %v1054_v63 }
  0x47   : > { %2889 = vmatpush3.bf16.xpose.msra.mxu0 %v2886_v41  ;;  %2861 = vmatpush3.bf16.xpose.msra.mxu1 %v3402_v33  ;;  %v2962_v41 = vpack.c.bf16 %v331_v31, %v324_v30 }
  0x48   : > { %2891 = vmatprep.subr.bf16.mxu0 %v2890_v17  ;;  %2863 = vmatprep.subr.bf16.mxu1 %v3414_v38 }
  0x4f   : > { %2893 = vmatpush3.bf16.xpose.msra.mxu0 %v2890_v17  ;;  %2865 = vmatpush3.bf16.xpose.msra.mxu1 %v3414_v38  ;;  %v302_v17 = vsub.f32 %v3187_v1, %v3190_v2  ;;  %v312_v1 = vsub.f32 %v170_v46, %v3440_v3 }
  0x50   : > { %2895 = vmatprep.subr.bf16.mxu0 %v2894_v50  ;;  %3027 = vmatprep.subr.bf16.mxu1 %v3429_v45 }
  0x51   : > { %v303_v23 = vand.u32 4294901760, %v302_v17  ;;  %v313_v24 = vand.u32 4294901760, %v312_v1 }
  0x53   : > { %v304_v30 = vsub.f32 %v302_v17, %v303_v23  ;;  %v314_v31 = vsub.f32 %v312_v1, %v313_v24 }
  0x57   : > { %2897 = vmatpush3.bf16.xpose.msra.mxu0 %v2894_v50 }
  0x58   : > { %2899 = vmatprep.subr.bf16.mxu0 %v3325_v47 }
  0x5e   : > { %2524 = vmatmul.mubr.f32.vlgmr.msra.gmra.mrb[0].mxu0 %v3440_v3 }
  0x5f   : > { %2901 = vmatpush3.bf16.xpose.msra.mxu0 %v3325_v47  ;;  %2558 = vmatprep.mubr.f32.mxu0 %v302_v17  ;;  %v305_v47 = vand.u32 4294901760, %v304_v30 }
  0x60   : > { %2903 = vmatprep.subr.bf16.mxu0 %v3346_v57 }
  0x61   : > { %2488 = vmatprep.mubr.f32.mxu1 %v305_v47 }
  0x67   : > { %2905 = vmatpush3.bf16.xpose.msra.mxu0 %v3346_v57  ;;  %v315_v57 = vand.u32 4294901760, %v314_v31 }
  0x68   : > { %2907 = vmatprep.subr.bf16.mxu0 %v3350_v59 }
  0x69   : > { %2489 = vmatmul.mubr.f32.vlgmr.msra.gmra.mrb[0].mxu1 %v315_v57 }
  0x6a   : > { %3029 = vmatpush3.bf16.msra.mxu1 %v3429_v45 }
  0x6f   : > { %2909 = vmatpush3.bf16.xpose.msra.mxu0 %v3350_v59  ;;  %v2966_v59 = vpack.c.bf16 %v345_v34, %v338_v32  ;;  %v2982_v32 = vpack.c.bf16 %v401_v15, %v394_v14  ;;  %v2986_v34 = vpack.c.bf16 %v415_v39, %v408_v28 }
  0x70   : > { %2911 = vmatprep.subr.bf16.mxu0 %v3360_v4 }
  0x77   : > { %2913 = vmatpush3.bf16.xpose.msra.mxu0 %v3360_v4  ;;  %v2970_v4 = vpack.c.bf16 %v359_v43, %v352_v42 }
  0x78   : > { %2915 = vmatprep.subr.bf16.mxu0 %v3364_v5 }
  0x7f   : > { %2917 = vmatpush3.bf16.xpose.msra.mxu0 %v3364_v5 }
  0x80   : > { %2919 = vmatprep.subr.bf16.mxu0 %v3368_v7 }
  0x87   : > { %2921 = vmatpush3.bf16.xpose.msra.mxu0 %v3368_v7 }
  0x88   : > { %2923 = vmatprep.subr.bf16.mxu0 %v3372_v8 }
  0x8f   : > { %2925 = vmatpush3.bf16.xpose.msra.mxu0 %v3372_v8 }
  0x90   : > { %2927 = vmatprep.subr.bf16.mxu0 %v3376_v9 }
  0x97   : > { %2929 = vmatpush3.bf16.xpose.msra.mxu0 %v3376_v9 }
  0x98   : > { %2931 = vmatprep.subr.bf16.mxu0 %v3220_v22 }
  0x9e   : > { %2559 = vmatmul.mubr.f32.vlgmr.msra.gmra.mrb[0].mxu0 %v312_v1 }
  0x9f   : > { %2933 = vmatpush3.bf16.xpose.msra.mxu0 %v3220_v22  ;;  %2593 = vmatprep.mubr.f32.mxu0 %v303_v23 }
  0xa0   : > { %2935 = vmatprep.subr.bf16.mxu0 %v3228_v26 }
  0xa7   : > { %2937 = vmatpush3.bf16.xpose.msra.mxu0 %v3228_v26 }
  0xa8   : > { %2939 = vmatprep.subr.bf16.mxu0 %v3277_v60 }
  0xaf   : > { %2941 = vmatpush3.bf16.xpose.msra.mxu0 %v3277_v60 }
  0xb0   : > { %2943 = vmatprep.subr.bf16.mxu0 %v3306_v19 }
  0xb7   : > { %2945 = vmatpush3.bf16.xpose.msra.mxu0 %v3306_v19 }
  0xb8   : > { %2947 = vmatprep.subr.bf16.mxu0 %v3378_v10 }
  0xbf   : > { %2949 = vmatpush3.bf16.xpose.msra.mxu0 %v3378_v10 }
  0xc0   : > { %2951 = vmatprep.subr.bf16.mxu0 %v3390_v6 }
  0xc7   : > { %2953 = vmatpush3.bf16.xpose.msra.mxu0 %v3390_v6 }
  0xc8   : > { %2955 = vmatprep.subr.bf16.mxu0 %v3402_v33 }
  0xcf   : > { %2957 = vmatpush3.bf16.xpose.msra.mxu0 %v3402_v33 }
  0xd0   : > { %2959 = vmatprep.subr.bf16.mxu0 %v3414_v38 }
  0xd7   : > { %2961 = vmatpush3.bf16.xpose.msra.mxu0 %v3414_v38 }
  0xd8   : > { %2963 = vmatprep.subr.bf16.mxu0 %v2962_v41 }
  0xde   : > { %2594 = vmatmul.mubr.f32.vlgmr.msra.gmra.mrb[0].mxu0 %v313_v24 }
  0xdf   : > { %2965 = vmatpush3.bf16.xpose.msra.mxu0 %v2962_v41  ;;  %2628 = vmatprep.mubr.f32.mxu0 %v3190_v2 }
  0xe0   : > { %2967 = vmatprep.subr.bf16.mxu0 %v2966_v59 }
  0xe7   : > { %2969 = vmatpush3.bf16.xpose.msra.mxu0 %v2966_v59 }
  0xe8   : > { %2971 = vmatprep.subr.bf16.mxu0 %v2970_v4 }
  0xef   : > { %2973 = vmatpush3.bf16.xpose.msra.mxu0 %v2970_v4 }
  0xf0   : > { %2975 = vmatprep.subr.bf16.mxu0 %v2974_v25 }
  0xf7   : > { %2977 = vmatpush3.bf16.xpose.msra.mxu0 %v2974_v25 }
  0xf8   : > { %2979 = vmatprep.subr.bf16.mxu0 %v2978_v27 }
  0xff   : > { %2981 = vmatpush3.bf16.xpose.msra.mxu0 %v2978_v27 }
 0x100   : > { %2983 = vmatprep.subr.bf16.mxu0 %v2982_v32 }
 0x107   : > { %2985 = vmatpush3.bf16.xpose.msra.mxu0 %v2982_v32 }
 0x108   : > { %2987 = vmatprep.subr.bf16.mxu0 %v2986_v34 }
 0x10f   : > { %2989 = vmatpush3.bf16.xpose.msra.mxu0 %v2986_v34 }
 0x110   : > { %2991 = vmatprep.subr.bf16.mxu0 %v2990_v35 }
 0x117   : > { %2993 = vmatpush3.bf16.xpose.msra.mxu0 %v2990_v35 }
 0x118   : > { %2995 = vmatprep.subr.bf16.mxu0 %v3220_v22 }
 0x11e   : > { %2629 = vmatmul.mubr.f32.vlgmr.msra.gmra.mrb[0].mxu0 %v3440_v3 }
 0x11f   : > { %2997 = vmatpush3.bf16.xpose.msra.mxu0 %v3220_v22  ;;  %2663 = vmatprep.mubr.f32.mxu0 %v3190_v2 }
 0x120   : > { %2999 = vmatprep.subr.bf16.mxu0 %v3228_v26 }
 0x127   : > { %3001 = vmatpush3.bf16.xpose.msra.mxu0 %v3228_v26 }
 0x128   : > { %3003 = vmatprep.subr.bf16.mxu0 %v3277_v60 }
 0x12f   : > { %3005 = vmatpush3.bf16.xpose.msra.mxu0 %v3277_v60 }
 0x130   : > { %3007 = vmatprep.subr.bf16.mxu0 %v3306_v19 }
 0x137   : > { %3009 = vmatpush3.bf16.xpose.msra.mxu0 %v3306_v19 }
 0x138   : > { %3011 = vmatprep.subr.bf16.mxu0 %v3378_v10 }
 0x13c   : > { %v2490_v2 = vpop.f32.mrb[0].mxu1 }
 0x13d   : > { %v307_v22 = vpop.f32.mrb[1].mxu1 }
 0x13f   : > { %3013 = vmatpush3.bf16.xpose.msra.mxu0 %v3378_v10 }
 0x140   : > { %3015 = vmatprep.subr.bf16.mxu0 %v3390_v6 }
 0x147   : > { %3017 = vmatpush3.bf16.xpose.msra.mxu0 %v3390_v6 }
 0x148   : > { %3019 = vmatprep.subr.bf16.mxu0 %v3402_v33 }
 0x14f   : > { %3021 = vmatpush3.bf16.xpose.msra.mxu0 %v3402_v33 }
 0x150   : > { %3023 = vmatprep.subr.bf16.mxu0 %v3414_v38 }
 0x157   : > { %3025 = vmatpush3.bf16.xpose.msra.mxu0 %v3414_v38 }
 0x15e   : > { %2664 = vmatmul.mubr.f32.vlgmr.msra.gmra.mrb[0].mxu0 %v3440_v3 }
 0x231   : > { %v2665_v26 = vpop.f32.mrb[0].mxu0 }
 0x232   : > { %v3050_v36 = vadd.f32 %v2665_v26, %v2490_v2  ;;  %v894_v42 = vpop.f32.mrb[1].mxu0 }
 0x233   : > { %v3051_v43 = vadd.f32 %v894_v42, %v307_v22  ;;  %v3535_v42 = vsub.f32 %v3183_v0, %v1054_v63 }
 0x234   : > { %905 = vst [vmem:[#allocation2 + $0x8] sm:$0xff] %v3050_v36 }
 0x235   : > { %904 = vst [vmem:[#allocation2] sm:$0xff] %v3051_v43  ;;  %973 = vxpose.xlu0.b32.start [1/2] (short) %v3051_v43, 128  ;;  %v3540_v43 = vsub.f32 %v3419_v16, %v1057_v29 }
 0x237   : > { %v3552_v16 = vpack.c.bf16 %v3540_v43, %v3535_v42 }
 0x23c   : > { %v906_v49 = vld [vmem:[#allocation2] sm:$0x3]  ;;  %v915_v55 = vld [vmem:[#allocation2 + $0x2] sm:$0x3]  ;;  %v923_v58 = vld [vmem:[#allocation2 + $0x4] sm:$0x3] }
 0x23d   : > { %v908_v60 = vsel %vm907_vm1, %v906_v49, -inf  ;;  %v916_v61 = vsel %vm907_vm1, %v915_v55, -inf  ;;  %v924_v13 = vsel %vm907_vm1, %v923_v58, -inf  ;;  %v931_v19 = vld [vmem:[#allocation2 + $0x6] sm:$0x3]  ;;  %v1283_v49 = vand.u32 4294901760, %v3535_v42 }
 0x23e   : > { %v909_v20 = vrot.slane %v908_v60, 4  ;;  %v917_v40 = vrot.slane %v916_v61, 4  ;;  %v925_v44 = vrot.slane %v924_v13, 4  ;;  %v932_v48 = vsel %vm907_vm1, %v931_v19, -inf }
 0x23f   : > { %v933_v51 = vrot.slane %v932_v48, 4  ;;  %v1290_v55 = vand.u32 4294901760, %v3540_v43  ;;  %v1284_v58 = vsub.f32 %v3535_v42, %v1283_v49 }
 0x240   : > { %v910_v52 = vmax.f32 %v908_v60, %v909_v20  ;;  %v918_v53 = vmax.f32 %v916_v61, %v917_v40  ;;  %v926_v54 = vmax.f32 %v924_v13, %v925_v44 }
 0x241   : > { %v934_v56 = vmax.f32 %v932_v48, %v933_v51  ;;  %v1291_v60 = vsub.f32 %v3540_v43, %v1290_v55  ;;  %v1285_v61 = vand.u32 4294901760, %v1284_v58 }
 0x242   : > { %v911_v5 = vrot.slane %v910_v52, 2  ;;  %v919_v7 = vrot.slane %v918_v53, 2  ;;  %v927_v8 = vrot.slane %v926_v54, 2 }
 0x243   : > { %v935_v9 = vrot.slane %v934_v56, 2  ;;  %v1292_v0 = vand.u32 4294901760, %v1291_v60 }
 0x244   : > { %v912_v10 = vmax.f32 %v910_v52, %v911_v5  ;;  %v920_v14 = vmax.f32 %v918_v53, %v919_v7  ;;  %v928_v15 = vmax.f32 %v926_v54, %v927_v8 }
 0x245   : > { %v936_v6 = vmax.f32 %v934_v56, %v935_v9  ;;  %v3030_v63 = vpack.c.bf16 %v1292_v0, %v1285_v61 }
 0x246   : > { %v913_v28 = vrot.slane %v912_v10, 1  ;;  %v921_v39 = vrot.slane %v920_v14, 1  ;;  %v929_v33 = vrot.slane %v928_v15, 1 }
 0x247   : > { %v937_v11 = vrot.slane %v936_v6, 1  ;;  %3031 = vmatprep.subr.bf16.mxu1 %v3030_v63 }
 0x248   : > { %v914_v12 = vmax.f32 %v912_v10, %v913_v28  ;;  %v922_v62 = vmax.f32 %v920_v14, %v921_v39  ;;  %v930_v37 = vmax.f32 %v928_v15, %v929_v33 }
 0x249   : > { %v938_v38 = vmax.f32 %v936_v6, %v937_v11 }
 0x24a   : > { %939 = vst [vmem:[#allocation2 + $0x8] sm:$0x1] %v914_v12  ;;  %940 = vst [vmem:[#allocation2 + $0x9] sm:$0x1] %v922_v62 }
 0x24b   : > { %941 = vst [vmem:[#allocation2 + $0xb] sm:$0x1] %v930_v37  ;;  %942 = vst [vmem:[#allocation2 + $0xc] sm:$0x1] %v938_v38 }
 0x251   : > { %v943_v18 = vld [vmem:[#allocation2 + $0x8] sm:$0x7] }
 0x252   : > { %v945_v21 = vsel %vm944_vm2, %v943_v18, -inf  ;;  %v952_v50 = vld [vmem:[#allocation2 + $0xb] sm:$0x3] }
 0x253   : > { %v946_v46 = vrot.slane %v945_v21, 4  ;;  %v953_v41 = vsel %vm907_vm1, %v952_v50, -inf }
 0x254   : > { %v954_v3 = vrot.slane %v953_v41, 4 }
 0x255   : > { %v947_v17 = vmax.f32 %v945_v21, %v946_v46 }
 0x256   : > { %v955_v1 = vmax.f32 %v953_v41, %v954_v3 }
 0x257   : > { %v948_v23 = vrot.slane %v947_v17, 2 }
 0x258   : > { %v956_v24 = vrot.slane %v955_v1, 2 }
 0x259   : > { %v949_v30 = vmax.f32 %v947_v17, %v948_v23 }
 0x25a   : > { %v957_v31 = vmax.f32 %v955_v1, %v956_v24 }
 0x25b   : > { %v950_v47 = vrot.slane %v949_v30, 1 }
 0x25c   : > { %v958_v57 = vrot.slane %v957_v31, 1 }
 0x25d   : > { %v951_v59 = vmax.f32 %v949_v30, %v950_v47 }
 0x25e   : > { %v959_v4 = vmax.f32 %v957_v31, %v958_v57 }
 0x25f   : > { %960 = vst [vmem:[#allocation2 + $0xd] sm:$0x1] %v951_v59 }
 0x260   : > { %961 = vst [vmem:[#allocation2 + $0xe] sm:$0x1] %v959_v4 }
 0x267   : > { %v962_v25 = vld [vmem:[#allocation2 + $0xd] sm:$0x3] }
 0x268   : > { %v963_v27 = vsel %vm907_vm1, %v962_v25, -inf }
 0x269   : > { %v964_v32 = vrot.slane %v963_v27, 4 }
 0x26b   : > { %v965_v34 = vmax.f32 %v963_v27, %v964_v32 }
 0x26d   : > { %v966_v35 = vrot.slane %v965_v34, 2 }
 0x26f   : > { %v967_v2 = vmax.f32 %v965_v34, %v966_v35 }
 0x271   : > { %v968_v22 = vrot.slane %v967_v2, 1 }
 0x273   : > { %v969_v26 = vmax.f32 %v967_v2, %v968_v22 }
 0x275   : > { %970 = vst [vmem:[#allocation2 + $0xf] sm:$0x1] %v969_v26 }
 0x27c   : > { %v972_v36 = vld [vmem:[#allocation2 + $0x8] sm:$0xff] }
 0x27d   : > { %974 = vxpose.xlu0.b32.end [2/2] (short) %v972_v36, 128 }
 0x2f9   : > { %v989_v29 = vpop.trf.xlu0 }
 0x2fa   : > { %v1006_v13 = vsel %vm165_vm0, %v989_v29, 0 }
 0x2fb   : > { %v3555_v19 = vand.u32 4294901760, %v1006_v13 }
 0x2fd   : > { %v3558_v20 = vsub.f32 %v1006_v13, %v3555_v19  ;;  %v990_v40 = vpop.trf.xlu0 }
 0x2fe   : > { %v1009_v44 = vsel %vm165_vm0, %v990_v40, 0 }
 0x2ff   : > { %v1122_v48 = vand.u32 4294901760, %v3558_v20  ;;  %v3562_v51 = vand.u32 4294901760, %v1009_v44 }
 0x301   : > { %v3565_v52 = vsub.f32 %v1009_v44, %v3562_v51  ;;  %v991_v53 = vpop.trf.xlu0  ;;  %v1123_v54 = vsub.f32 %v3558_v20, %v1122_v48 }
 0x302   : > { %v1012_v56 = vsel %vm165_vm0, %v991_v53, 0 }
 0x303   : > { %v1132_v5 = vand.u32 4294901760, %v3565_v52  ;;  %v3572_v7 = vand.u32 4294901760, %v1012_v56  ;;  %v1124_v8 = vand.u32 4294901760, %v1123_v54 }
 0x305   : > { %v1133_v9 = vsub.f32 %v3565_v52, %v1132_v5  ;;  %v3578_v10 = vsub.f32 %v1012_v56, %v3572_v7  ;;  %2670 = vmatprep.mubr.f32.mxu1 %v1124_v8  ;;  %v992_v14 = vpop.trf.xlu0 }
 0x306   : > { %v1015_v15 = vsel %vm165_vm0, %v992_v14, 0 }
 0x307   : > { %v1134_v6 = vand.u32 4294901760, %v1133_v9  ;;  %v1142_v28 = vand.u32 4294901760, %v3578_v10  ;;  %v3582_v39 = vand.u32 4294901760, %v1015_v15 }
 0x309   : > { %v3585_v33 = vsub.f32 %v1015_v15, %v3582_v39  ;;  %2671 = vmatmul.mubr.f32.vlgmr.msra.gmra.mrb[2].mxu1 %v1134_v6  ;;  %v993_v11 = vpop.trf.xlu0  ;;  %v1143_v12 = vsub.f32 %v3578_v10, %v1142_v28 }
 0x30a   : > { %v1018_v62 = vsel %vm165_vm0, %v993_v11, 0  ;;  %3033 = vmatpush3.bf16.msra.mxu1 %v3030_v63 }
 0x30b   : > { %v1152_v37 = vand.u32 4294901760, %v3585_v33  ;;  %v3592_v38 = vand.u32 4294901760, %v1018_v62  ;;  %v1144_v18 = vand.u32 4294901760, %v1143_v12  ;;  %3035 = vmatprep.subr.bf16.mxu1 %v3552_v16 }
 0x30d   : > { %v3596_v21 = vsub.f32 %v1018_v62, %v3592_v38  ;;  %2673 = vmatprep.mubr.f32.mxu1 %v1144_v18  ;;  %v994_v50 = vpop.trf.xlu0  ;;  %v1153_v46 = vsub.f32 %v3585_v33, %v1152_v37 }
 0x30e   : > { %v1021_v41 = vsel %vm165_vm0, %v994_v50, 0 }
 0x30f   : > { %v1162_v3 = vand.u32 4294901760, %v3596_v21  ;;  %v3603_v17 = vand.u32 4294901760, %v1021_v41  ;;  %v1154_v1 = vand.u32 4294901760, %v1153_v46 }
 0x311   : > { %v3606_v23 = vsub.f32 %v1021_v41, %v3603_v17  ;;  %2674 = vmatmul.mubr.f32.gmra.mrb[4].mxu1 %v1154_v1  ;;  %v995_v24 = vpop.trf.xlu0  ;;  %v1163_v30 = vsub.f32 %v3596_v21, %v1162_v3 }
 0x312   : > { %v1024_v31 = vsel %vm165_vm0, %v995_v24, 0 }
 0x313   : > { %v1172_v47 = vand.u32 4294901760, %v3606_v23  ;;  %v3613_v57 = vand.u32 4294901760, %v1024_v31  ;;  %v1164_v59 = vand.u32 4294901760, %v1163_v30 }
 0x315   : > { %v3616_v4 = vsub.f32 %v1024_v31, %v3613_v57  ;;  %2676 = vmatprep.mubr.f32.mxu1 %v1164_v59  ;;  %v996_v25 = vpop.trf.xlu0  ;;  %v1173_v27 = vsub.f32 %v3606_v23, %v1172_v47 }
 0x316   : > { %v1027_v32 = vsel %vm165_vm0, %v996_v25, 0 }
 0x317   : > { %v1182_v34 = vand.u32 4294901760, %v3616_v4  ;;  %v3623_v35 = vand.u32 4294901760, %v1027_v32  ;;  %v1174_v2 = vand.u32 4294901760, %v1173_v27 }
 0x319   : > { %v3626_v22 = vsub.f32 %v1027_v32, %v3623_v35  ;;  %2677 = vmatmul.mubr.f32.gmra.mrb[6].mxu1 %v1174_v2  ;;  %v997_v26 = vpop.trf.xlu0  ;;  %v1183_v36 = vsub.f32 %v3616_v4, %v1182_v34 }
 0x31a   : > { %v1030_v58 = vsel %vm165_vm0, %v997_v26, 0 }
 0x31b   : > { %v1192_v60 = vand.u32 4294901760, %v3626_v22  ;;  %v3633_v61 = vand.u32 4294901760, %v1030_v58  ;;  %v1184_v0 = vand.u32 4294901760, %v1183_v36 }
 0x31d   : > { %v3636_v63 = vsub.f32 %v1030_v58, %v3633_v61  ;;  %2679 = vmatprep.mubr.f32.mxu1 %v1184_v0  ;;  %v998_v29 = vpop.trf.xlu0  ;;  %v1193_v13 = vsub.f32 %v3626_v22, %v1192_v60 }
 0x31e   : > { %v1033_v40 = vsel %vm165_vm0, %v998_v29, 0 }
 0x31f   : > { %v1202_v44 = vand.u32 4294901760, %v3636_v63  ;;  %v3643_v53 = vand.u32 4294901760, %v1033_v40  ;;  %v1194_v54 = vand.u32 4294901760, %v1193_v13 }
 0x321   : > { %v3646_v56 = vsub.f32 %v1033_v40, %v3643_v53  ;;  %2680 = vmatmul.mubr.f32.gmra.mrb[8].mxu1 %v1194_v54  ;;  %v999_v8 = vpop.trf.xlu0  ;;  %v1203_v9 = vsub.f32 %v3636_v63, %v1202_v44 }
 0x322   : > { %v1036_v14 = vsel %vm165_vm0, %v999_v8, 0 }
 0x323   : > { %v1212_v15 = vand.u32 4294901760, %v3646_v56  ;;  %v3653_v6 = vand.u32 4294901760, %v1036_v14  ;;  %v1204_v11 = vand.u32 4294901760, %v1203_v9 }
 0x325   : > { %v3656_v12 = vsub.f32 %v1036_v14, %v3653_v6  ;;  %2682 = vmatprep.mubr.f32.mxu1 %v1204_v11  ;;  %v1000_v62 = vpop.trf.xlu0  ;;  %v1213_v18 = vsub.f32 %v3646_v56, %v1212_v15 }
 0x326   : > { %v1039_v50 = vsel %vm165_vm0, %v1000_v62, 0 }
 0x327   : > { %v1222_v46 = vand.u32 4294901760, %v3656_v12  ;;  %v3663_v41 = vand.u32 4294901760, %v1039_v50  ;;  %v1214_v1 = vand.u32 4294901760, %v1213_v18 }
 0x329   : > { %v3666_v24 = vsub.f32 %v1039_v50, %v3663_v41  ;;  %2683 = vmatmul.mubr.f32.gmra.mrb[10].mxu1 %v1214_v1  ;;  %v1001_v30 = vpop.trf.xlu0  ;;  %v1223_v31 = vsub.f32 %v3656_v12, %v1222_v46 }
 0x32a   : > { %v1042_v59 = vsel %vm165_vm0, %v1001_v30, 0 }
 0x32b   : > { %v1232_v25 = vand.u32 4294901760, %v3666_v24  ;;  %v3673_v27 = vand.u32 4294901760, %v1042_v59  ;;  %v1224_v32 = vand.u32 4294901760, %v1223_v31 }
 0x32d   : > { %v3676_v2 = vsub.f32 %v1042_v59, %v3673_v27  ;;  %2685 = vmatprep.mubr.f32.mxu1 %v1224_v32  ;;  %v1002_v26 = vpop.trf.xlu0  ;;  %v1233_v36 = vsub.f32 %v3666_v24, %v1232_v25 }
 0x32e   : > { %v1045_v58 = vsel %vm165_vm0, %v1002_v26, 0 }
 0x32f   : > { %v1242_v0 = vand.u32 4294901760, %v3676_v2  ;;  %v3683_v29 = vand.u32 4294901760, %v1045_v58  ;;  %v1234_v13 = vand.u32 4294901760, %v1233_v36 }
 0x331   : > { %v3686_v40 = vsub.f32 %v1045_v58, %v3683_v29  ;;  %2686 = vmatmul.mubr.f32.gmra.mrb[12].mxu1 %v1234_v13  ;;  %v1003_v54 = vpop.trf.xlu0  ;;  %v1243_v8 = vsub.f32 %v3676_v2, %v1242_v0 }
 0x332   : > { %v1048_v9 = vsel %vm165_vm0, %v1003_v54, 0 }
 0x333   : > { %v1252_v14 = vand.u32 4294901760, %v3686_v40  ;;  %v3693_v11 = vand.u32 4294901760, %v1048_v9  ;;  %v1244_v62 = vand.u32 4294901760, %v1243_v8 }
 0x335   : > { %v3696_v18 = vsub.f32 %v1048_v9, %v3693_v11  ;;  %2688 = vmatprep.mubr.f32.mxu1 %v1244_v62  ;;  %v1004_v50 = vpop.trf.xlu0  ;;  %v1253_v1 = vsub.f32 %v3686_v40, %v1252_v14 }
 0x336   : > { %v1051_v30 = vsel %vm165_vm0, %v1004_v50, 0 }
 0x337   : > { %v1262_v31 = vand.u32 4294901760, %v3696_v18  ;;  %v3703_v59 = vand.u32 4294901760, %v1051_v30  ;;  %v1254_v32 = vand.u32 4294901760, %v1253_v1 }
 0x339   : > { %v3706_v26 = vsub.f32 %v1051_v30, %v3703_v59  ;;  %2689 = vmatmul.mubr.f32.gmra.mrb[14].mxu1 %v1254_v32  ;;  %v1263_v36 = vsub.f32 %v3696_v18, %v1262_v31 }
 0x33b   : > { %v1272_v58 = vand.u32 4294901760, %v3706_v26  ;;  %v1264_v13 = vand.u32 4294901760, %v1263_v36 }
 0x33d   : > { %2691 = vmatprep.mubr.f32.mxu1 %v1264_v13  ;;  %v1273_v54 = vsub.f32 %v3706_v26, %v1272_v58 }
 0x33f   : > { %v1274_v8 = vand.u32 4294901760, %v1273_v54 }
 0x341   : > { %2692 = vmatmul.mubr.f32.gmra.mrb[16].mxu1 %v1274_v8 }
 0x342   : > { %2698 = vmatprep.mubr.f32.mxu1 %v3555_v19 }
 0x345   : > { %2699 = vmatmul.mubr.f32.vlgmr.msra.gmra.mrb[2].mxu1 %v3562_v51 }
 0x346   : > { %3037 = vmatpush3.bf16.msra.mxu1 %v3552_v16  ;;  %2701 = vmatprep.mubr.f32.mxu1 %v3572_v7  ;;  %v3042_v16 = vpack.c.bf16 %v1290_v55, %v1283_v49 }
 0x347   : > { %3039 = vmatprep.subr.bf16.mxu1 %v3429_v45 }
 0x349   : > { %2702 = vmatmul.mubr.f32.gmra.mrb[4].mxu1 %v3582_v39 }
 0x34a   : > { %2704 = vmatprep.mubr.f32.mxu1 %v3592_v38 }
 0x34d   : > { %2705 = vmatmul.mubr.f32.gmra.mrb[6].mxu1 %v3603_v17 }
 0x34e   : > { %2707 = vmatprep.mubr.f32.mxu1 %v3613_v57 }
 0x351   : > { %2708 = vmatmul.mubr.f32.gmra.mrb[8].mxu1 %v3623_v35 }
 0x352   : > { %2710 = vmatprep.mubr.f32.mxu1 %v3633_v61 }
 0x355   : > { %2711 = vmatmul.mubr.f32.gmra.mrb[10].mxu1 %v3643_v53 }
 0x356   : > { %2713 = vmatprep.mubr.f32.mxu1 %v3653_v6 }
 0x359   : > { %2714 = vmatmul.mubr.f32.gmra.mrb[12].mxu1 %v3663_v41 }
 0x35a   : > { %2716 = vmatprep.mubr.f32.mxu1 %v3673_v27 }
 0x35d   : > { %2717 = vmatmul.mubr.f32.gmra.mrb[14].mxu1 %v3683_v29 }
 0x35e   : > { %2719 = vmatprep.mubr.f32.mxu1 %v3693_v11 }
 0x361   : > { %2720 = vmatmul.mubr.f32.gmra.mrb[16].mxu1 %v3703_v59 }
 0x362   : > { %2726 = vmatprep.mubr.f32.mxu1 %v3558_v20 }
 0x365   : > { %2727 = vmatmul.mubr.f32.vlgmr.msra.gmra.mrb[2].mxu1 %v3565_v52 }
 0x366   : > { %3041 = vmatpush3.bf16.msra.mxu1 %v3429_v45  ;;  %2729 = vmatprep.mubr.f32.mxu1 %v3578_v10 }
 0x367   : > { %3043 = vmatprep.subr.bf16.mxu1 %v3042_v16 }
 0x369   : > { %2730 = vmatmul.mubr.f32.gmra.mrb[4].mxu1 %v3585_v33 }
 0x36a   : > { %2732 = vmatprep.mubr.f32.mxu1 %v3596_v21 }
 0x36d   : > { %2733 = vmatmul.mubr.f32.gmra.mrb[6].mxu1 %v3606_v23 }
 0x36e   : > { %2735 = vmatprep.mubr.f32.mxu1 %v3616_v4 }
 0x371   : > { %2736 = vmatmul.mubr.f32.gmra.mrb[8].mxu1 %v3626_v22 }
 0x372   : > { %2738 = vmatprep.mubr.f32.mxu1 %v3636_v63 }
 0x375   : > { %2739 = vmatmul.mubr.f32.gmra.mrb[10].mxu1 %v3646_v56 }
 0x376   : > { %2741 = vmatprep.mubr.f32.mxu1 %v3656_v12 }
 0x379   : > { %2742 = vmatmul.mubr.f32.gmra.mrb[12].mxu1 %v3666_v24 }
 0x37a   : > { %2744 = vmatprep.mubr.f32.mxu1 %v3676_v2 }
 0x37d   : > { %2745 = vmatmul.mubr.f32.gmra.mrb[14].mxu1 %v3686_v40 }
 0x37e   : > { %2747 = vmatprep.mubr.f32.mxu1 %v3696_v18 }
 0x381   : > { %2748 = vmatmul.mubr.f32.gmra.mrb[16].mxu1 %v3706_v26 }
 0x382   : > { %2754 = vmatprep.mubr.f32.mxu1 %v1122_v48 }
 0x385   : > { %2755 = vmatmul.mubr.f32.vlgmr.msra.gmra.mrb[2].mxu1 %v1132_v5 }
 0x386   : > { %3045 = vmatpush3.bf16.msra.mxu1 %v3042_v16  ;;  %2757 = vmatprep.mubr.f32.mxu1 %v1142_v28 }
 0x387   : > { %3047 = vmatprep.subr.bf16.mxu1 %v3429_v45 }
 0x389   : > { %2758 = vmatmul.mubr.f32.gmra.mrb[4].mxu1 %v1152_v37 }
 0x38a   : > { %2760 = vmatprep.mubr.f32.mxu1 %v1162_v3 }
 0x38d   : > { %2761 = vmatmul.mubr.f32.gmra.mrb[6].mxu1 %v1172_v47 }
 0x38e   : > { %2763 = vmatprep.mubr.f32.mxu1 %v1182_v34 }
 0x391   : > { %2764 = vmatmul.mubr.f32.gmra.mrb[8].mxu1 %v1192_v60 }
 0x392   : > { %2766 = vmatprep.mubr.f32.mxu1 %v1202_v44 }
 0x395   : > { %2767 = vmatmul.mubr.f32.gmra.mrb[10].mxu1 %v1212_v15 }
 0x396   : > { %2769 = vmatprep.mubr.f32.mxu1 %v1222_v46 }
 0x399   : > { %2770 = vmatmul.mubr.f32.gmra.mrb[12].mxu1 %v1232_v25 }
 0x39a   : > { %2772 = vmatprep.mubr.f32.mxu1 %v1242_v0 }
 0x39d   : > { %2773 = vmatmul.mubr.f32.gmra.mrb[14].mxu1 %v1252_v14 }
 0x39e   : > { %2775 = vmatprep.mubr.f32.mxu1 %v1262_v31 }
 0x3a1   : > { %2776 = vmatmul.mubr.f32.gmra.mrb[16].mxu1 %v1272_v58 }
 0x3a2   : > { %2782 = vmatprep.mubr.f32.mxu1 %v3555_v19 }
 0x3a5   : > { %2783 = vmatmul.mubr.f32.vlgmr.msra.gmra.mrb[2].mxu1 %v3562_v51 }
 0x3a6   : > { %3049 = vmatpush3.bf16.msra.mxu1 %v3429_v45  ;;  %2785 = vmatprep.mubr.f32.mxu1 %v3572_v7 }
 0x3a9   : > { %2786 = vmatmul.mubr.f32.gmra.mrb[4].mxu1 %v3582_v39 }
 0x3aa   : > { %2788 = vmatprep.mubr.f32.mxu1 %v3592_v38 }
 0x3ad   : > { %2789 = vmatmul.mubr.f32.gmra.mrb[6].mxu1 %v3603_v17 }
 0x3ae   : > { %2791 = vmatprep.mubr.f32.mxu1 %v3613_v57 }
 0x3b1   : > { %2792 = vmatmul.mubr.f32.gmra.mrb[8].mxu1 %v3623_v35 }
 0x3b2   : > { %2794 = vmatprep.mubr.f32.mxu1 %v3633_v61 }
 0x3b5   : > { %2795 = vmatmul.mubr.f32.gmra.mrb[10].mxu1 %v3643_v53 }
 0x3b6   : > { %2797 = vmatprep.mubr.f32.mxu1 %v3653_v6 }
 0x3b9   : > { %2798 = vmatmul.mubr.f32.gmra.mrb[12].mxu1 %v3663_v41 }
 0x3ba   : > { %2800 = vmatprep.mubr.f32.mxu1 %v3673_v27 }
 0x3bd   : > { %2801 = vmatmul.mubr.f32.gmra.mrb[14].mxu1 %v3683_v29 }
 0x3be   : > { %2803 = vmatprep.mubr.f32.mxu1 %v3693_v11 }
 0x3c1   : > { %2804 = vmatmul.mubr.f32.gmra.mrb[16].mxu1 %v3703_v59 }
 0x3c2   : > { %2810 = vmatprep.mubr.f32.mxu1 %v3555_v19 }
 0x3c5   : > { %2811 = vmatmul.mubr.f32.vlgmr.msra.gmra.mrb[2].mxu1 %v3562_v51 }
 0x3c6   : > { %2813 = vmatprep.mubr.f32.mxu1 %v3572_v7 }
 0x3c9   : > { %2814 = vmatmul.mubr.f32.gmra.mrb[4].mxu1 %v3582_v39 }
 0x3ca   : > { %2816 = vmatprep.mubr.f32.mxu1 %v3592_v38 }
 0x3cd   : > { %2817 = vmatmul.mubr.f32.gmra.mrb[6].mxu1 %v3603_v17 }
 0x3ce   : > { %2819 = vmatprep.mubr.f32.mxu1 %v3613_v57 }
 0x3d1   : > { %2820 = vmatmul.mubr.f32.gmra.mrb[8].mxu1 %v3623_v35 }
 0x3d2   : > { %2822 = vmatprep.mubr.f32.mxu1 %v3633_v61 }
 0x3d5   : > { %2823 = vmatmul.mubr.f32.gmra.mrb[10].mxu1 %v3643_v53 }
 0x3d6   : > { %2825 = vmatprep.mubr.f32.mxu1 %v3653_v6 }
 0x3d9   : > { %2826 = vmatmul.mubr.f32.gmra.mrb[12].mxu1 %v3663_v41 }
 0x3da   : > { %2828 = vmatprep.mubr.f32.mxu1 %v3673_v27 }
 0x3dd   : > { %2829 = vmatmul.mubr.f32.gmra.mrb[14].mxu1 %v3683_v29 }
 0x3de   : > { %2831 = vmatprep.mubr.f32.mxu1 %v3693_v11 }
 0x3e1   : > { %2832 = vmatmul.mubr.f32.gmra.mrb[16].mxu1 %v3703_v59 }
 0x498   : > { %v2812_v45 = vpop.f32.mrb[2].mxu1 }
 0x499   : > { %2158 = vst.msk [vmem:[%s3821_s22 + $0x8] sm:$0xff] %vm165_vm0, %v2812_v45  ;;  %v2063_v42 = vpop.f32.mrb[3].mxu1 }
 0x49a   : > { %2157 = vst.msk [vmem:[%s3821_s22] sm:$0xff] %vm165_vm0, %v2063_v42 }
 0x49c   : > { %v2815_v43 = vpop.f32.mrb[4].mxu1 }
 0x49d   : > { %2160 = vst.msk [vmem:[%s3821_s22 + $0x18] sm:$0xff] %vm165_vm0, %v2815_v43  ;;  %v2075_v49 = vpop.f32.mrb[5].mxu1 }
 0x49e   : > { %2159 = vst.msk [vmem:[%s3821_s22 + $0x10] sm:$0xff] %vm165_vm0, %v2075_v49 }
 0x4a0   : > { %v2818_v55 = vpop.f32.mrb[6].mxu1 }
 0x4a1   : > { %2162 = vst.msk [vmem:[%s3821_s22 + $0x28] sm:$0xff] %vm165_vm0, %v2818_v55  ;;  %v2087_v19 = vpop.f32.mrb[7].mxu1 }
 0x4a2   : > { %2161 = vst.msk [vmem:[%s3821_s22 + $0x20] sm:$0xff] %vm165_vm0, %v2087_v19 }
 0x4a4   : > { %v2821_v20 = vpop.f32.mrb[8].mxu1 }
 0x4a5   : > { %2164 = vst.msk [vmem:[%s3821_s22 + $0x38] sm:$0xff] %vm165_vm0, %v2821_v20  ;;  %v2099_v48 = vpop.f32.mrb[9].mxu1 }
 0x4a6   : > { %2163 = vst.msk [vmem:[%s3821_s22 + $0x30] sm:$0xff] %vm165_vm0, %v2099_v48 }
 0x4a8   : > { %v2824_v51 = vpop.f32.mrb[10].mxu1 }
 0x4a9   : > { %2166 = vst.msk [vmem:[%s3821_s22 + $0x48] sm:$0xff] %vm165_vm0, %v2824_v51  ;;  %v2111_v52 = vpop.f32.mrb[11].mxu1 }
 0x4aa   : > { %2165 = vst.msk [vmem:[%s3821_s22 + $0x40] sm:$0xff] %vm165_vm0, %v2111_v52 }
 0x4ac   : > { %v2827_v5 = vpop.f32.mrb[12].mxu1 }
 0x4ad   : > { %2168 = vst.msk [vmem:[%s3821_s22 + $0x58] sm:$0xff] %vm165_vm0, %v2827_v5  ;;  %v2123_v7 = vpop.f32.mrb[13].mxu1 }
 0x4ae   : > { %2167 = vst.msk [vmem:[%s3821_s22 + $0x50] sm:$0xff] %vm165_vm0, %v2123_v7 }
 0x4b0   : > { %v2830_v10 = vpop.f32.mrb[14].mxu1 }
 0x4b1   : > { %2170 = vst.msk [vmem:[%s3821_s22 + $0x68] sm:$0xff] %vm165_vm0, %v2830_v10  ;;  %v2135_v28 = vpop.f32.mrb[15].mxu1 }
 0x4b2   : > { %2169 = vst.msk [vmem:[%s3821_s22 + $0x60] sm:$0xff] %vm165_vm0, %v2135_v28 }
 0x4b4   : > { %v2833_v39 = vpop.f32.mrb[16].mxu1 }
 0x4b5   : > { %2172 = vst.msk [vmem:[%s3821_s22 + $0x78] sm:$0xff] %vm165_vm0, %v2833_v39  ;;  %v2147_v33 = vpop.f32.mrb[17].mxu1 }
 0x4b6   : > { %2171 = vst.msk [vmem:[%s3821_s22 + $0x70] sm:$0xff] %vm165_vm0, %v2147_v33 }
 0x4b7 PF: > { %s12_s9 = sadd.s32 1, %s3155_s9  }
 0x4b8   : > { %p9_p4 = scmp.ge.s32.totalorder %s12_s9, 4  }
 0x4ba   :  { %11 = sbr.rel (!%p9_p4) target bundleno = 1 (0x1), region = 58 }

</bundles_post_ra>
